<compile_context>
chip_gen: v7x
topology: tpu7x:2x2x1
jax: 0.10.0
libtpu: 0.0.40
codegen_flags: <defaults>
</compile_context>

<pallas_src>
import math
import jax
import jax.numpy as jnp
from jax import lax
from jax.experimental import pallas as pl
from jax.experimental.pallas import tpu as pltpu  # noqa: F401  (TPU backend assumed)

# ----------------------------- config -----------------------------
B = 2            # batch size (number of graphs)
N = 16           # nodes per graph
F_DIM = 8        # feat_dim
H_DIM = 32       # hidden_dim
N_HEADS = 4      # num_heads
NEG_SLOPE = 0.01 # F.leaky_relu default
BN_EPS = 1e-5
C_OUT = 2 * H_DIM
NB = B * N                      # 32 rows
LANES = N_HEADS * NB            # 128 logit lanes: column = h*NB + global_source_node
NEG_INF = -1e30


# -------------- fused kernel: proj + multi-head GaAN (mean) + BatchNorm --------------
def fused_kernel(feat_ref, bias_ref, w_ref, adst_ref, asrc_ref, ones_ref, gb_ref, out_ref):
    # feat_ref: (NB, F)        flattened node features
    # bias_ref: (NB, 128)      additive attention bias: 0 for edge k->i (same graph), -1e30 otherwise
    # w_ref:    (F, NH*H + H)  [:, :NH*H] = per-head Wa concatenated, [:, NH*H:] = proj_fc weight
    # adst_ref: (NH*H, 128)    block slab: rows h*H..(h+1)*H, cols h*NB..(h+1)*NB = a_r_h (broadcast)
    # asrc_ref: (NH*H, 8)      block slab: col h = a_l of head h (cols 4..7 zero padding)
    # ones_ref: (128, 128)     block-diagonal ones (per-head segments) for denominator broadcast
    # gb_ref:   (2, 2H)        row 0 = bn gamma, row 1 = bn beta
    # out_ref:  (NB, 2H)
    feat = feat_ref[...]                                                     # (32, 8)

    # merged projection: [per-head Wa || proj_fc] in one MXU pass
    zp = jnp.dot(feat, w_ref[...], preferred_element_type=jnp.float32)       # (32, 160)
    z_all = zp[:, :N_HEADS * H_DIM]                                          # (32, 128)
    proj = zp[:, N_HEADS * H_DIM:]                                           # (32, 32)

    # destination-term logits, emitted directly in the (row=dest, col=[h, src]) layout
    e_dst = jnp.dot(z_all, adst_ref[...], preferred_element_type=jnp.float32)  # (32, 128)

    # source-term logits: E_src[k, h] = a_l_h . z_k^h  ->  one (1,128) row vector
    e_src = jnp.dot(z_all, asrc_ref[...], preferred_element_type=jnp.float32)  # (32, 8)
    e_src_t = jnp.transpose(e_src)                                             # (8, 32)
    e_src_row = jnp.concatenate(
        [e_src_t[h:h + 1, :] for h in range(N_HEADS)], axis=-1)                # (1, 128)

    # lane-dense logits, leaky_relu, additive mask — each done ONCE
    e = e_dst + e_src_row                                                    # (32, 128)
    e = jnp.where(e > 0, e, NEG_SLOPE * e)                                   # leaky_relu
    e = e + bias_ref[...]                                                    # mask non-edges / cross-batch

    # stable softmax over each 32-lane head segment (per-row max >= every segment max)
    m = jnp.max(e, axis=-1, keepdims=True)                                   # (32, 1)
    p = jnp.exp(e - m)                                                       # masked lanes -> exactly 0
    denom = jnp.dot(p, ones_ref[...], preferred_element_type=jnp.float32)    # segment sums, broadcast in place
    denom = jnp.maximum(denom, 1e-30)                                        # guard (never hit with self-loops)
    alpha = p * pl.reciprocal(denom, approx=True)                            # (32, 128)

    # head-stacked Z: rows h*NB + k hold z_k^h; cross-batch alpha lanes are 0, so ONE matmul
    # covers all batches and heads; mean over heads is a single scale.
    z_stk = jnp.concatenate(
        [z_all[:, h * H_DIM:(h + 1) * H_DIM] for h in range(N_HEADS)], axis=0)  # (128, 32)
    head_mean = jnp.dot(alpha, z_stk,
                        preferred_element_type=jnp.float32) * (1.0 / N_HEADS)   # (32, 32)

    x = jnp.concatenate([proj, head_mean], axis=-1)                          # (32, 64)

    # fused BatchNorm2d (training-mode batch stats); reductions on the MXU (idle in the tail)
    ones_row = jnp.ones((1, NB), jnp.float32)
    inv_rows = 1.0 / float(NB)
    s = jnp.dot(ones_row, x, preferred_element_type=jnp.float32)             # (1, 64)
    ss = jnp.dot(ones_row, x * x, preferred_element_type=jnp.float32)        # (1, 64)
    mean = s * inv_rows
    var = ss * inv_rows - mean * mean                                        # biased variance (PyTorch norm)
    inv = lax.rsqrt(var + BN_EPS)
    gamma = gb_ref[0:1, :]
    beta = gb_ref[1:2, :]
    out_ref[...] = (x - mean) * (inv * gamma) + beta                         # single full-block store


COST = pl.CostEstimate(flops=2_600_000, transcendentals=8_500, bytes_accessed=170_000)


# -------------------- full forward --------------------
def spat_att_layer(feat, adj, params):
    # feat: (B, N, F)  adj: (B, N, N) with adj[b, i, j] = 1 iff edge j -> i (self-loops included)
    feat_flat = feat.reshape(NB, F_DIM)

    # host-side additive attention bias (review item #1): block-diagonal over graphs, tiled per head
    edge = (jnp.eye(B, dtype=jnp.float32)[:, None, :, None]
            * adj[:, :, None, :]).reshape(NB, NB)                            # (32, 32)
    bias = jnp.where(edge > 0, 0.0, NEG_INF)                                 # 0 / -1e30
    bias = jnp.tile(bias, (1, N_HEADS))                                      # (32, 128)

    out2d = pl.pallas_call(
        fused_kernel,
        out_shape=jax.ShapeDtypeStruct((NB, C_OUT), jnp.float32),
        cost_estimate=COST,
    )(feat_flat, bias, params["w_slab"], params["a_dst_slab"],
      params["a_src_slab"], params["ones_seg"], params["gb_slab"])
    return out2d.reshape(B, N, 1, C_OUT)                                     # (batch, nodes, seq=1, 2*hidden)


# -------------------- deterministic parameter init + host-side packing --------------------
def xavier_normal(key, shape, fan_in, fan_out, gain):
    std = gain * math.sqrt(2.0 / (fan_in + fan_out))
    return std * jax.random.normal(key, shape, dtype=jnp.float32)


def init_params(key):
    gain = math.sqrt(2.0 / (1.0 + NEG_SLOPE ** 2))   # nn.init.calculate_gain('leaky_relu')
    k1, k2, k3, k4 = jax.random.split(key, 4)
    w_proj = xavier_normal(k1, (F_DIM, H_DIM), F_DIM, H_DIM, gain)           # proj_fc.weight (transposed)
    w_a = xavier_normal(k2, (N_HEADS, F_DIM, H_DIM), F_DIM, H_DIM, gain)     # per-head Wa
    a_l = xavier_normal(k3, (N_HEADS, H_DIM), H_DIM, 1, gain)                # att_out_fc_l
    a_r = xavier_normal(k4, (N_HEADS, H_DIM), H_DIM, 1, gain)                # att_out_fc_r

    # weight slab: [Wa_head0 | ... | Wa_head{NH-1} | W_proj]  -> (F, NH*H + H) = (8, 160)
    w_a_cat = jnp.transpose(w_a, (1, 0, 2)).reshape(F_DIM, N_HEADS * H_DIM)
    w_slab = jnp.concatenate([w_a_cat, w_proj], axis=1)

    # destination-term slab (NH*H, NH*NB) = (128, 128): a_r_h broadcast across its 32-lane segment
    a_dst_slab = jnp.zeros((N_HEADS * H_DIM, LANES), dtype=jnp.float32)
    # source-term slab (NH*H, 8): column h = a_l of head h (cols 4..7 stay zero)
    a_src_slab = jnp.zeros((N_HEADS * H_DIM, 2 * N_HEADS), dtype=jnp.float32)
    for h in range(N_HEADS):
        a_dst_slab = a_dst_slab.at[h * H_DIM:(h + 1) * H_DIM, h * NB:(h + 1) * NB].set(
            jnp.broadcast_to(a_r[h][:, None], (H_DIM, NB)))
        a_src_slab = a_src_slab.at[h * H_DIM:(h + 1) * H_DIM, h].set(a_l[h])

    # block-diagonal ones (per-head 32x32 blocks) for the in-place denominator broadcast
    ones_seg = jnp.kron(jnp.eye(N_HEADS, dtype=jnp.float32),
                        jnp.ones((NB, NB), dtype=jnp.float32))               # (128, 128)

    # bn gamma / beta packed as one (2, 2H) slab
    gb_slab = jnp.concatenate([jnp.ones((1, C_OUT), jnp.float32),
                               jnp.zeros((1, C_OUT), jnp.float32)], axis=0)
    return dict(w_slab=w_slab, a_dst_slab=a_dst_slab, a_src_slab=a_src_slab,
                ones_seg=ones_seg, gb_slab=gb_slab)


if __name__ == "__main__":
    key = jax.random.PRNGKey(0)
    k_feat, k_adj, k_par = jax.random.split(key, 3)

    feat = jax.random.normal(k_feat, (B, N, F_DIM), dtype=jnp.float32)
    # deterministic random graph adjacency with self-loops; adj[b, i, j] = edge j -> i
    rand = jax.random.uniform(k_adj, (B, N, N))
    eye = jnp.eye(N, dtype=jnp.float32)[None, :, :]
    adj = jnp.maximum((rand < 0.6).astype(jnp.float32), eye)

    params = init_params(k_par)

    out = jax.jit(spat_att_layer)(feat, adj, params)
    out = jax.block_until_ready(out)

    assert out.shape == (B, N, 1, C_OUT), out.shape
    assert bool(jnp.all(jnp.isfinite(out)))
    print("KERNEL_OK")
</pallas_src>

<mosaic_0001>
module attributes {stable_mosaic.version = 11 : i64} {
  func.func @fused_kernel(%arg0: memref<32x8xf32, #tpu.memory_space<vmem>>, %arg1: memref<32x128xf32, #tpu.memory_space<vmem>>, %arg2: memref<8x160xf32, #tpu.memory_space<vmem>>, %arg3: memref<128x128xf32, #tpu.memory_space<vmem>>, %arg4: memref<128x8xf32, #tpu.memory_space<vmem>>, %arg5: memref<128x128xf32, #tpu.memory_space<vmem>>, %arg6: memref<2x64xf32, #tpu.memory_space<vmem>>, %arg7: memref<32x64xf32, #tpu.memory_space<vmem>>) attributes {dimension_semantics = [], scalar_prefetch = 0 : i64, scratch_operands = 0 : i64, tpu.core_type = #tpu.core_type<tc>} {
    %c0 = arith.constant 0 : index
    %c0_0 = arith.constant 0 : index
    %0 = vector.load %arg0[%c0, %c0_0] : memref<32x8xf32, #tpu.memory_space<vmem>>, vector<32x8xf32>
    %c0_1 = arith.constant 0 : index
    %c0_2 = arith.constant 0 : index
    %1 = vector.load %arg2[%c0_1, %c0_2] : memref<8x160xf32, #tpu.memory_space<vmem>>, vector<8x160xf32>
    %cst = arith.constant dense<0.000000e+00> : vector<32x160xf32>
    %2 = tpu.matmul %0, %1, %cst {dimension_numbers = #tpu.dot_dimension_numbers<[1], [0], [0], [1], [0, 0, 1, 1], [], []>} : vector<32x8xf32>, vector<8x160xf32>, vector<32x160xf32> -> vector<32x160xf32>
    %3 = vector.extract_strided_slice %2 {offsets = [0, 0], sizes = [32, 128], strides = [1, 1]} : vector<32x160xf32> to vector<32x128xf32>
    %4 = vector.extract_strided_slice %2 {offsets = [0, 128], sizes = [32, 32], strides = [1, 1]} : vector<32x160xf32> to vector<32x32xf32>
    %c0_3 = arith.constant 0 : index
    %c0_4 = arith.constant 0 : index
    %5 = vector.load %arg3[%c0_3, %c0_4] : memref<128x128xf32, #tpu.memory_space<vmem>>, vector<128x128xf32>
    %cst_5 = arith.constant dense<0.000000e+00> : vector<32x128xf32>
    %6 = tpu.matmul %3, %5, %cst_5 {dimension_numbers = #tpu.dot_dimension_numbers<[1], [0], [0], [1], [0, 0, 1, 1], [], []>} : vector<32x128xf32>, vector<128x128xf32>, vector<32x128xf32> -> vector<32x128xf32>
    %c0_6 = arith.constant 0 : index
    %c0_7 = arith.constant 0 : index
    %7 = vector.load %arg4[%c0_6, %c0_7] : memref<128x8xf32, #tpu.memory_space<vmem>>, vector<128x8xf32>
    %cst_8 = arith.constant dense<0.000000e+00> : vector<32x8xf32>
    %8 = tpu.matmul %3, %7, %cst_8 {dimension_numbers = #tpu.dot_dimension_numbers<[1], [0], [0], [1], [0, 0, 1, 1], [], []>} : vector<32x128xf32>, vector<128x8xf32>, vector<32x8xf32> -> vector<32x8xf32>
    %9 = tpu.transpose %8, [1, 0] : vector<32x8xf32> -> vector<8x32xf32>
    %10 = vector.extract_strided_slice %9 {offsets = [0, 0], sizes = [1, 32], strides = [1, 1]} : vector<8x32xf32> to vector<1x32xf32>
    %11 = vector.extract_strided_slice %9 {offsets = [1, 0], sizes = [1, 32], strides = [1, 1]} : vector<8x32xf32> to vector<1x32xf32>
    %12 = vector.extract_strided_slice %9 {offsets = [2, 0], sizes = [1, 32], strides = [1, 1]} : vector<8x32xf32> to vector<1x32xf32>
    %13 = vector.extract_strided_slice %9 {offsets = [3, 0], sizes = [1, 32], strides = [1, 1]} : vector<8x32xf32> to vector<1x32xf32>
    %14 = tpu.concatenate %10, %11, %12, %13 in 1 : vector<1x32xf32>, vector<1x32xf32>, vector<1x32xf32>, vector<1x32xf32> -> vector<1x128xf32>
    %15 = vector.broadcast %14 : vector<1x128xf32> to vector<32x128xf32>
    %16 = arith.addf %6, %15 : vector<32x128xf32>
    %cst_9 = arith.constant 0.000000e+00 : f32
    %17 = vector.broadcast %cst_9 : f32 to vector<32x128xf32>
    %18 = arith.cmpf ogt, %16, %17 : vector<32x128xf32>
    %cst_10 = arith.constant 0.00999999977 : f32
    %19 = vector.broadcast %cst_10 : f32 to vector<32x128xf32>
    %20 = arith.mulf %19, %16 : vector<32x128xf32>
    %21 = arith.select %18, %16, %20 : vector<32x128xi1>, vector<32x128xf32>
    %c0_11 = arith.constant 0 : index
    %c0_12 = arith.constant 0 : index
    %22 = vector.load %arg1[%c0_11, %c0_12] : memref<32x128xf32, #tpu.memory_space<vmem>>, vector<32x128xf32>
    %23 = vector.shape_cast %22 : vector<32x128xf32> to vector<32x128xf32>
    %24 = arith.addf %21, %23 : vector<32x128xf32>
    %cst_13 = arith.constant dense<0xFF800000> : vector<32xf32>
    %25 = vector.multi_reduction <maximumf>, %24, %cst_13 [1] : vector<32x128xf32> to vector<32xf32>
    %26 = vector.shape_cast %25 : vector<32xf32> to vector<32x1xf32>
    %27 = vector.broadcast %26 : vector<32x1xf32> to vector<32x128xf32>
    %28 = arith.subf %24, %27 : vector<32x128xf32>
    %29 = math.exp %28 : vector<32x128xf32>
    %c0_14 = arith.constant 0 : index
    %c0_15 = arith.constant 0 : index
    %30 = vector.load %arg5[%c0_14, %c0_15] : memref<128x128xf32, #tpu.memory_space<vmem>>, vector<128x128xf32>
    %cst_16 = arith.constant dense<0.000000e+00> : vector<32x128xf32>
    %31 = tpu.matmul %29, %30, %cst_16 {dimension_numbers = #tpu.dot_dimension_numbers<[1], [0], [0], [1], [0, 0, 1, 1], [], []>} : vector<32x128xf32>, vector<128x128xf32>, vector<32x128xf32> -> vector<32x128xf32>
    %cst_17 = arith.constant 1.000000e-30 : f32
    %32 = vector.broadcast %cst_17 : f32 to vector<32x128xf32>
    %33 = arith.maximumf %31, %32 : vector<32x128xf32>
    %34 = tpu.reciprocal %33 {approx = true} : vector<32x128xf32> -> vector<32x128xf32>
    %35 = arith.mulf %29, %34 : vector<32x128xf32>
    %36 = vector.extract_strided_slice %3 {offsets = [0, 0], sizes = [32, 32], strides = [1, 1]} : vector<32x128xf32> to vector<32x32xf32>
    %37 = vector.extract_strided_slice %3 {offsets = [0, 32], sizes = [32, 32], strides = [1, 1]} : vector<32x128xf32> to vector<32x32xf32>
    %38 = vector.extract_strided_slice %3 {offsets = [0, 64], sizes = [32, 32], strides = [1, 1]} : vector<32x128xf32> to vector<32x32xf32>
    %39 = vector.extract_strided_slice %3 {offsets = [0, 96], sizes = [32, 32], strides = [1, 1]} : vector<32x128xf32> to vector<32x32xf32>
    %40 = tpu.concatenate %36, %37, %38, %39 in 0 : vector<32x32xf32>, vector<32x32xf32>, vector<32x32xf32>, vector<32x32xf32> -> vector<128x32xf32>
    %cst_18 = arith.constant dense<0.000000e+00> : vector<32x32xf32>
    %41 = tpu.matmul %35, %40, %cst_18 {dimension_numbers = #tpu.dot_dimension_numbers<[1], [0], [0], [1], [0, 0, 1, 1], [], []>} : vector<32x128xf32>, vector<128x32xf32>, vector<32x32xf32> -> vector<32x32xf32>
    %cst_19 = arith.constant 2.500000e-01 : f32
    %42 = vector.broadcast %cst_19 : f32 to vector<32x32xf32>
    %43 = arith.mulf %41, %42 : vector<32x32xf32>
    %44 = tpu.concatenate %4, %43 in 1 : vector<32x32xf32>, vector<32x32xf32> -> vector<32x64xf32>
    %cst_20 = arith.constant 1.000000e+00 : f32
    %45 = vector.broadcast %cst_20 : f32 to vector<1x32xf32>
    %cst_21 = arith.constant dense<0.000000e+00> : vector<1x64xf32>
    %46 = tpu.matmul %45, %44, %cst_21 {dimension_numbers = #tpu.dot_dimension_numbers<[1], [0], [0], [1], [0, 0, 1, 1], [], []>} : vector<1x32xf32>, vector<32x64xf32>, vector<1x64xf32> -> vector<1x64xf32>
    %47 = arith.mulf %44, %44 : vector<32x64xf32>
    %cst_22 = arith.constant dense<0.000000e+00> : vector<1x64xf32>
    %48 = tpu.matmul %45, %47, %cst_22 {dimension_numbers = #tpu.dot_dimension_numbers<[1], [0], [0], [1], [0, 0, 1, 1], [], []>} : vector<1x32xf32>, vector<32x64xf32>, vector<1x64xf32> -> vector<1x64xf32>
    %cst_23 = arith.constant 3.125000e-02 : f32
    %49 = vector.broadcast %cst_23 : f32 to vector<1x64xf32>
    %50 = arith.mulf %46, %49 : vector<1x64xf32>
    %cst_24 = arith.constant 3.125000e-02 : f32
    %51 = vector.broadcast %cst_24 : f32 to vector<1x64xf32>
    %52 = arith.mulf %48, %51 : vector<1x64xf32>
    %53 = arith.mulf %50, %50 : vector<1x64xf32>
    %54 = arith.subf %52, %53 : vector<1x64xf32>
    %cst_25 = arith.constant 9.99999974E-6 : f32
    %55 = vector.broadcast %cst_25 : f32 to vector<1x64xf32>
    %56 = arith.addf %54, %55 : vector<1x64xf32>
    %57 = math.rsqrt %56 : vector<1x64xf32>
    %c0_26 = arith.constant 0 : index
    %c0_27 = arith.constant 0 : index
    %58 = vector.load %arg6[%c0_26, %c0_27] : memref<2x64xf32, #tpu.memory_space<vmem>>, vector<1x64xf32>
    %c1 = arith.constant 1 : index
    %c0_28 = arith.constant 0 : index
    %59 = vector.load %arg6[%c1, %c0_28] : memref<2x64xf32, #tpu.memory_space<vmem>>, vector<1x64xf32>
    %60 = vector.broadcast %50 : vector<1x64xf32> to vector<32x64xf32>
    %61 = arith.subf %44, %60 : vector<32x64xf32>
    %62 = arith.mulf %57, %58 : vector<1x64xf32>
    %63 = vector.broadcast %62 : vector<1x64xf32> to vector<32x64xf32>
    %64 = arith.mulf %61, %63 : vector<32x64xf32>
    %65 = vector.broadcast %59 : vector<1x64xf32> to vector<32x64xf32>
    %66 = arith.addf %64, %65 : vector<32x64xf32>
    %c0_29 = arith.constant 0 : index
    %c0_30 = arith.constant 0 : index
    %67 = vector.load %arg7[%c0_29, %c0_30] : memref<32x64xf32, #tpu.memory_space<vmem>>, vector<32x64xf32>
    tpu.vector_store %arg7[%c0_29, %c0_30], %66 {strides = array<i32>} : memref<32x64xf32, #tpu.memory_space<vmem>>, vector<32x64xf32>,
    return
  }
}

</mosaic_0001>

<bundles_post_ra>
// kernel: tile.9
= control target key start
LH: loop header
LB: loop body
LE: loop exit
PB: predicated region body
PF: predicated region fallthrough
CT: control target
= control target key end

     0   :  { %vm162_vm0 = vcmask 1047556   ;;  %s398_s10 = smov 96   ;;  %vm164_vm1 = vcmask 261120   ;;  %s400_s21 = smov 32   ;;  %vm201_vm2 = vcmask 1048320   ;;  %vm244_vm3 = vcmask 785920   ;;  %s579_s0 = inlined_call_operand.vmem [shape: f32[32,4,32], index: 0, kind: input, shape index: {}]   ;;  %s580_s1 = inlined_call_operand.vmem [shape: f32[32,128], index: 1, kind: output, shape index: {}]  }
   0x1   :  { %v376_v0 = vld [vmem:[%s579_s0 + $0x1c] sm:$0xf]  ;;  %v377_v1 = vld [vmem:[%s579_s0 + $0x18] sm:$0xf]  ;;  %v378_v2 = vld [vmem:[%s579_s0 + $0x14] sm:$0xf] }
   0x2   :  { %128 = vst [vmem:[#allocation0 + $0x38] sm:$0xf] %v376_v0  ;;  %133 = vst [vmem:[#allocation0 + $0x30] sm:$0xf] %v377_v1  ;;  %v379_v3 = vld [vmem:[%s579_s0 + $0x10] sm:$0xf] }
   0x3   :  { %138 = vst [vmem:[#allocation0 + $0x28] sm:$0xf] %v378_v2  ;;  %v380_v4 = vld [vmem:[%s579_s0 + $0xc] sm:$0xf]  ;;  %v381_v5 = vld [vmem:[%s579_s0 + $0x8] sm:$0xf] }
   0x4   :  { %143 = vst [vmem:[#allocation0 + $0x20] sm:$0xf] %v379_v3  ;;  %148 = vst [vmem:[#allocation0 + $0x18] sm:$0xf] %v380_v4  ;;  %v382_v6 = vld [vmem:[%s579_s0 + $0x4] sm:$0xf] }
   0x5   :  { %153 = vst [vmem:[#allocation0 + $0x10] sm:$0xf] %v381_v5  ;;  %v158_v7 = vld [vmem:[%s579_s0] sm:$0xf]  ;;  %157 = vst [vmem:[#allocation0 + $0x8] sm:$0xf] %v382_v6 }
   0x6   :  { %159 = vst [vmem:[#allocation0] sm:$0xf] %v158_v7  ;;  %v360_v8 = vld [vmem:[%s579_s0 + $0x5c] sm:$0xf]  ;;  %v361_v9 = vld [vmem:[%s579_s0 + $0x58] sm:$0xf] }
   0x7   :  { %v362_v10 = vld [vmem:[%s579_s0 + $0x54] sm:$0xf]  ;;  %48 = vst [vmem:[#allocation0 + $0xb8] sm:$0xf] %v360_v8  ;;  %53 = vst [vmem:[#allocation0 + $0xb0] sm:$0xf] %v361_v9 }
   0x8   :  { %58 = vst [vmem:[#allocation0 + $0xa8] sm:$0xf] %v362_v10  ;;  %v363_v11 = vld [vmem:[%s579_s0 + $0x50] sm:$0xf]  ;;  %v364_v12 = vld [vmem:[%s579_s0 + $0x4c] sm:$0xf] }
   0x9   :  { %v365_v13 = vld [vmem:[%s579_s0 + $0x48] sm:$0xf]  ;;  %63 = vst [vmem:[#allocation0 + $0xa0] sm:$0xf] %v363_v11  ;;  %68 = vst [vmem:[#allocation0 + $0x98] sm:$0xf] %v364_v12 }
   0xa   :  { %73 = vst [vmem:[#allocation0 + $0x90] sm:$0xf] %v365_v13  ;;  %v366_v14 = vld [vmem:[%s579_s0 + $0x44] sm:$0xf]  ;;  %v367_v15 = vld [vmem:[%s579_s0 + $0x40] sm:$0xf] }
   0xb   :  { %v368_v16 = vld [vmem:[%s579_s0 + $0x3c] sm:$0xf]  ;;  %78 = vst [vmem:[#allocation0 + $0x88] sm:$0xf] %v366_v14  ;;  %83 = vst [vmem:[#allocation0 + $0x80] sm:$0xf] %v367_v15 }
   0xc   :  { %88 = vst [vmem:[#allocation0 + $0x78] sm:$0xf] %v368_v16  ;;  %v369_v17 = vld [vmem:[%s579_s0 + $0x38] sm:$0xf]  ;;  %v370_v18 = vld [vmem:[%s579_s0 + $0x34] sm:$0xf] }
   0xd   :  { %v371_v19 = vld [vmem:[%s579_s0 + $0x30] sm:$0xf]  ;;  %93 = vst [vmem:[#allocation0 + $0x70] sm:$0xf] %v369_v17  ;;  %98 = vst [vmem:[#allocation0 + $0x68] sm:$0xf] %v370_v18 }
   0xe   :  { %103 = vst [vmem:[#allocation0 + $0x60] sm:$0xf] %v371_v19  ;;  %v372_v20 = vld [vmem:[%s579_s0 + $0x2c] sm:$0xf]  ;;  %v373_v21 = vld [vmem:[%s579_s0 + $0x28] sm:$0xf] }
   0xf   :  { %v374_v22 = vld [vmem:[%s579_s0 + $0x24] sm:$0xf]  ;;  %108 = vst [vmem:[#allocation0 + $0x58] sm:$0xf] %v372_v20  ;;  %113 = vst [vmem:[#allocation0 + $0x50] sm:$0xf] %v373_v21 }
  0x10   :  { %118 = vst [vmem:[#allocation0 + $0x48] sm:$0xf] %v374_v22  ;;  %v375_v23 = vld [vmem:[%s579_s0 + $0x20] sm:$0xf]  ;;  %v352_v24 = vld [vmem:[%s579_s0 + $0x7c] sm:$0xf] }
  0x11   :  { %v353_v25 = vld [vmem:[%s579_s0 + $0x78] sm:$0xf]  ;;  %123 = vst [vmem:[#allocation0 + $0x40] sm:$0xf] %v375_v23  ;;  %8 = vst [vmem:[#allocation0 + $0xf8] sm:$0xf] %v352_v24 }
  0x12   :  { %v196_v26 = vld [vmem:[#allocation0 + $0x3] ss:$8 sm:$0xf0]   ;;  %13 = vst [vmem:[#allocation0 + $0xf0] sm:$0xf] %v353_v25  ;;  %vm287_vm4 = vcmask 523520  }
  0x13   :  { %v354_v27 = vld [vmem:[%s579_s0 + $0x74] sm:$0xf]  ;;  %v194_v28 = vld [vmem:[#allocation0 + $0x3] ss:$8 sm:$0xf]  }
  0x14   :  { %18 = vst [vmem:[#allocation0 + $0xe8] sm:$0xf] %v354_v27  ;;  %v355_v29 = vld [vmem:[%s579_s0 + $0x70] sm:$0xf]  ;;  %v198_v30 = vsel %vm162_vm0, %v196_v26, %v194_v28  ;;  %v356_v31 = vld [vmem:[%s579_s0 + $0x6c] sm:$0xf] }
  0x15   :  { %23 = vst [vmem:[#allocation0 + $0xe0] sm:$0xf] %v355_v29  ;;  %v357_v32 = vld [vmem:[%s579_s0 + $0x68] sm:$0xf]  ;;  %v358_v33 = vld [vmem:[%s579_s0 + $0x64] sm:$0xf]  ;;  %199 = vrot.lane.b32.xlu0 %v198_v30, %s398_s10 }
  0x16   :  { %v217_v34 = vld [vmem:[#allocation0 + $0x83] ss:$8 sm:$0xf0]   ;;  %28 = vst [vmem:[#allocation0 + $0xd8] sm:$0xf] %v356_v31 }
  0x17   :  { %33 = vst [vmem:[#allocation0 + $0xd0] sm:$0xf] %v357_v32  ;;  %38 = vst [vmem:[#allocation0 + $0xc8] sm:$0xf] %v358_v33  ;;  %v359_v35 = vld [vmem:[%s579_s0 + $0x60] sm:$0xf] }
  0x18   :  { %v215_v36 = vld [vmem:[#allocation0 + $0x83] ss:$8 sm:$0xf]   ;;  %43 = vst [vmem:[#allocation0 + $0xc0] sm:$0xf] %v359_v35  ;;  %s399_s0 = smov 64  }
  0x19   :  { %v219_v37 = vsel %vm162_vm0, %v217_v34, %v215_v36  ;;  %v206_v38 = vld [vmem:[#allocation0 + $0x43] ss:$8 sm:$0xf0]   ;;  %v237_v39 = vld [vmem:[#allocation0 + $0x2] ss:$8 sm:$0xf]  }
  0x1a   :  { %220 = vrot.lane.b32.xlu1 %v219_v37, %s398_s10  ;;  %v204_v40 = vld [vmem:[#allocation0 + $0x43] ss:$8 sm:$0xf]   ;;  %v239_v41 = vld [vmem:[#allocation0 + $0x2] ss:$8 sm:$0xf0]  }
  0x1b   :  { %v208_v42 = vsel %vm162_vm0, %v206_v38, %v204_v40  ;;  %v249_v44 = vld [vmem:[#allocation0 + $0x42] ss:$8 sm:$0xf0]   ;;  %v241_v45 = vsel %vm162_vm0, %v239_v41, %v237_v39  ;;  %v280_v52 = vld [vmem:[#allocation0 + $0x1] ss:$8 sm:$0xf]  }
  0x1c   :  { %209 = vrot.lane.b32.xlu0 %v208_v42, %s398_s10  ;;  %v228_v43 = vld [vmem:[#allocation0 + $0xc3] ss:$8 sm:$0xf0]   ;;  %v247_v46 = vld [vmem:[#allocation0 + $0x42] ss:$8 sm:$0xf]  }
  0x1d   :  { %v258_v47 = vld [vmem:[#allocation0 + $0x82] ss:$8 sm:$0xf]   ;;  %v251_v53 = vsel %vm162_vm0, %v249_v44, %v247_v46  ;;  %v282_v55 = vld [vmem:[#allocation0 + $0x1] ss:$8 sm:$0xf0]  }
  0x1e   :  { %v260_v49 = vld [vmem:[#allocation0 + $0x82] ss:$8 sm:$0xf0]   ;;  %v160_v56 = vld [vmem:[#allocation0] ss:$8 sm:$0xf]   ;;  %v284_v4 = vsel %vm162_vm0, %v282_v55, %v280_v52 }
  0x1f   :  { %v226_v48 = vld [vmem:[#allocation0 + $0xc3] ss:$8 sm:$0xf]   ;;  %v271_v51 = vld [vmem:[#allocation0 + $0xc2] ss:$8 sm:$0xf0]   ;;  %v262_v54 = vsel %vm162_vm0, %v260_v49, %v258_v47 }
  0x20   :  { %v230_v50 = vsel %vm162_vm0, %v228_v43, %v226_v48  ;;  %242 = vrot.lane.b32.xlu0 %v241_v45, %s399_s0  ;;  %v269_v57 = vld [vmem:[#allocation0 + $0xc2] ss:$8 sm:$0xf]   ;;  %v161_v58 = vld [vmem:[#allocation0] ss:$8 sm:$0xf0]  }
  0x21   :  { %231 = vrot.lane.b32.xlu1 %v230_v50, %s398_s10  ;;  %v163_v59 = vsel %vm162_vm0, %v161_v58, %v160_v56  ;;  %v176_v60 = vld [vmem:[#allocation0 + $0x80] ss:$8 sm:$0xf]   ;;  %v290_v62 = vld [vmem:[#allocation0 + $0x41] ss:$8 sm:$0xf]   ;;  %v273_v3 = vsel %vm162_vm0, %v271_v51, %v269_v57 }
  0x22   :  { %v178_v61 = vld [vmem:[#allocation0 + $0x80] ss:$8 sm:$0xf0]   ;;  %v292_v63 = vld [vmem:[#allocation0 + $0x41] ss:$8 sm:$0xf0]  }
  0x23   :  { %165 = vst.msk [vmem:[%s580_s1] sm:$0xff] %vm164_vm1, %v163_v59   ;;  %v180_v0 = vsel %vm162_vm0, %v178_v61, %v176_v60  ;;  %v167_v1 = vld [vmem:[#allocation0 + $0x40] ss:$8 sm:$0xf]   ;;  %v294_v11 = vsel %vm162_vm0, %v292_v63, %v290_v62 }
  0x24   :  { %263 = vrot.lane.b32.xlu0 %v262_v54, %s399_s0  ;;  %v169_v2 = vld [vmem:[#allocation0 + $0x40] ss:$8 sm:$0xf0]   ;;  %384 = vst.msk [vmem:[%s580_s1 + $0x10] sm:$0xff] %vm164_vm1, %v180_v0  }
  0x25   :  { %252 = vrot.lane.b32.xlu1 %v251_v53, %s399_s0  ;;  %v171_v5 = vsel %vm162_vm0, %v169_v2, %v167_v1  ;;  %v185_v6 = vld [vmem:[#allocation0 + $0xc0] ss:$8 sm:$0xf]   ;;  %v301_v8 = vld [vmem:[#allocation0 + $0x81] ss:$8 sm:$0xf]  }
  0x26   :  { %v187_v7 = vld [vmem:[#allocation0 + $0xc0] ss:$8 sm:$0xf0]   ;;  %v303_v9 = vld [vmem:[#allocation0 + $0x81] ss:$8 sm:$0xf0]  }
  0x27   :  { %383 = vst.msk [vmem:[%s580_s1 + $0x8] sm:$0xff] %vm164_vm1, %v171_v5   ;;  %v189_v10 = vsel %vm162_vm0, %v187_v7, %v185_v6  ;;  %v305_v12 = vsel %vm162_vm0, %v303_v9, %v301_v8  ;;  %v312_v13 = vld [vmem:[#allocation0 + $0xc1] ss:$8 sm:$0xf]  }
  0x28   :  { %385 = vst.msk [vmem:[%s580_s1 + $0x18] sm:$0xff] %vm164_vm1, %v189_v10   ;;  %285 = vrot.lane.b32.xlu0 %v284_v4, %s400_s21  ;;  %v314_v14 = vld [vmem:[#allocation0 + $0xc1] ss:$8 sm:$0xf0]  }
  0x29   :  { %274 = vrot.lane.b32.xlu1 %v273_v3, %s399_s0  ;;  %v316_v15 = vsel %vm162_vm0, %v314_v14, %v312_v13 }
  0x2c   :  { %306 = vrot.lane.b32.xlu0 %v305_v12, %s400_s21 }
  0x2d   :  { %295 = vrot.lane.b32.xlu1 %v294_v11, %s400_s21 }
  0x31   :  { %317 = vrot.lane.b32.xlu1 %v316_v15, %s400_s21 }
  0x87   :  { %v200_v16 = vpop.permute.xlu0 %199  }
  0x88   :  { %202 = vst.msk [vmem:[%s580_s1] sm:$0xff] %vm201_vm2, %v200_v16  }
  0x8c   :  { %v221_v17 = vpop.permute.xlu1 %220  }
  0x8d   :  { %387 = vst.msk [vmem:[%s580_s1 + $0x10] sm:$0xff] %vm201_vm2, %v221_v17  }
  0x8e   :  { %v210_v18 = vpop.permute.xlu0 %209  }
  0x8f   :  { %386 = vst.msk [vmem:[%s580_s1 + $0x8] sm:$0xff] %vm201_vm2, %v210_v18  }
  0x92   :  { %v243_v20 = vpop.permute.xlu0 %242  }
  0x93   :  { %v232_v19 = vpop.permute.xlu1 %231   ;;  %245 = vst.msk [vmem:[%s580_s1] sm:$0xff] %vm244_vm3, %v243_v20  }
  0x94   :  { %388 = vst.msk [vmem:[%s580_s1 + $0x18] sm:$0xff] %vm201_vm2, %v232_v19  }
  0x96   :  { %v264_v22 = vpop.permute.xlu0 %263  }
  0x97   :  { %v253_v21 = vpop.permute.xlu1 %252   ;;  %390 = vst.msk [vmem:[%s580_s1 + $0x10] sm:$0xff] %vm244_vm3, %v264_v22  }
  0x98   :  { %389 = vst.msk [vmem:[%s580_s1 + $0x8] sm:$0xff] %vm244_vm3, %v253_v21  }
  0x9a   :  { %v286_v24 = vpop.permute.xlu0 %285  }
  0x9b   :  { %v275_v23 = vpop.permute.xlu1 %274   ;;  %288 = vst.msk [vmem:[%s580_s1] sm:$0xff] %vm287_vm4, %v286_v24  }
  0x9c   :  { %391 = vst.msk [vmem:[%s580_s1 + $0x18] sm:$0xff] %vm244_vm3, %v275_v23  }
  0x9e   :  { %v307_v26 = vpop.permute.xlu0 %306  }
  0x9f   :  { %v296_v25 = vpop.permute.xlu1 %295   ;;  %393 = vst.msk [vmem:[%s580_s1 + $0x10] sm:$0xff] %vm287_vm4, %v307_v26  }
  0xa0   :  { %392 = vst.msk [vmem:[%s580_s1 + $0x8] sm:$0xff] %vm287_vm4, %v296_v25  }
  0xa3   :  { %v318_v27 = vpop.permute.xlu1 %317  }
  0xa4   :  { %394 = vst.msk [vmem:[%s580_s1 + $0x18] sm:$0xff] %vm287_vm4, %v318_v27  }

// kernel: spat_att_layer.1
= control target key start
LH: loop header
LB: loop body
LE: loop exit
PB: predicated region body
PF: predicated region fallthrough
CT: control target
= control target key end

     0   :  { %vm33_vm0 = vcmask 64512   ;;  %v1387_v3 = vmov 0.0   ;;  %s1691_s0 = inlined_call_operand.vmem [shape: f32[32,8], index: 0, kind: input, shape index: {}]   ;;  %s1692_s1 = inlined_call_operand.vmem [shape: f32[32,128], index: 1, kind: input, shape index: {}]   ;;  %s1693_s2 = inlined_call_operand.vmem [shape: f32[8,160], index: 2, kind: input, shape index: {}]   ;;  %s1694_s3 = inlined_call_operand.vmem [shape: f32[128,128], index: 3, kind: input, shape index: {}]   ;;  %s1695_s4 = inlined_call_operand.vmem [shape: f32[128,8], index: 4, kind: input, shape index: {}]   ;;  %s1696_s5 = inlined_call_operand.vmem [shape: f32[128,128], index: 5, kind: input, shape index: {}]   ;;  %s1697_s6 = inlined_call_operand.vmem [shape: f32[2,64], index: 6, kind: input, shape index: {}]   ;;  %s1698_s7 = inlined_call_operand.hbm [shape: f32[32,64], index: 7, kind: output, shape index: {}]  }
   0x1   :  { %v32_v0 = vld [vmem:[%s1693_s2 + $0x8] sm:$0xff]  ;;  %v31_v1 = vld [vmem:[%s1693_s2] sm:$0xff]  ;;  %110 = vmatprep.mubr.f32.mxu0 %v1387_v3  ;;  %v153_v10 = vld [vmem:[%s1695_s4 + $0x10] sm:$0xff] }
   0x2   :  { %v27_v2 = vld [vmem:[%s1691_s0] sm:$0xff]  ;;  %46 = vmatprep.subr.mxu0 %v32_v0  ;;  %v28_v4 = vld [vmem:[%s1691_s0 + $0x8] sm:$0xff]  ;;  %v154_v11 = vld [vmem:[%s1695_s4 + $0x18] sm:$0xff] }
   0x3   :  { %47 = vmatpush1.msra.mxu0 %v31_v1  ;;  %v151_v5 = vld [vmem:[%s1695_s4] sm:$0xff]  ;;  %v152_v6 = vld [vmem:[%s1695_s4 + $0x8] sm:$0xff]  ;;  %v1169_v13 = vpack.c.bf16 %v154_v11, %v153_v10  ;;  %v137_v14 = vld [vmem:[%s1694_s3 + $0x10] sm:$0xff] }
   0x4   :  { %v135_v7 = vld [vmem:[%s1694_s3] sm:$0xff]  ;;  %894 = vmatmul.mubr.msk.f32.vlgmr.msra.gmra.mrb[0].mxu0 %vm33_vm0, %v27_v2  ;;  %v1165_v8 = vpack.c.bf16 %v152_v6, %v151_v5  ;;  %v136_v9 = vld [vmem:[%s1694_s3 + $0x8] sm:$0xff]  ;;  %v138_v15 = vld [vmem:[%s1694_s3 + $0x18] sm:$0xff] }
   0x5   :  { %116 = vmatprep.mubr.f32.mxu0 %v1387_v3  ;;  %v1197_v12 = vpack.c.bf16 %v136_v9, %v135_v7  ;;  %v155_v16 = vld [vmem:[%s1695_s4 + $0x20] sm:$0xff]  ;;  %v1201_v17 = vpack.c.bf16 %v138_v15, %v137_v14  ;;  %v156_v18 = vld [vmem:[%s1695_s4 + $0x28] sm:$0xff]  ;;  %v29_v22 = vld [vmem:[%s1691_s0 + $0x10] sm:$0xff] }
   0x6   :  { %1166 = vmatprep.subr.bf16.mxu1 %v1165_v8  ;;  %v139_v19 = vld [vmem:[%s1694_s3 + $0x20] sm:$0xff]  ;;  %v140_v20 = vld [vmem:[%s1694_s3 + $0x28] sm:$0xff]  ;;  %v1173_v21 = vpack.c.bf16 %v156_v18, %v155_v16  ;;  %v157_v23 = vld [vmem:[%s1695_s4 + $0x30] sm:$0xff] }
   0x7   :  { %1198 = vmatprep.subr.bf16.mxu0 %v1197_v12  ;;  %1168 = vmatpush3.bf16.msra.mxu1 %v1165_v8  ;;  %v158_v24 = vld [vmem:[%s1695_s4 + $0x38] sm:$0xff]  ;;  %v1205_v25 = vpack.c.bf16 %v140_v20, %v139_v19  ;;  %v141_v26 = vld [vmem:[%s1694_s3 + $0x30] sm:$0xff] }
   0x8   :  { %895 = vmatmul.mubr.msk.f32.gmra.mrb[2].mxu0 %vm33_vm0, %v28_v4  ;;  %1170 = vmatprep.subr.bf16.mxu1 %v1169_v13  ;;  %v142_v27 = vld [vmem:[%s1694_s3 + $0x38] sm:$0xff]  ;;  %v1177_v28 = vpack.c.bf16 %v158_v24, %v157_v23 }
   0x9   :  { %122 = vmatprep.mubr.f32.mxu0 %v1387_v3  ;;  %1200 = vmatpush3.bf16.msra.mxu0 %v1197_v12 }
   0xa   :  { %1202 = vmatprep.subr.bf16.mxu0 %v1201_v17 }
   0xb   :  { %1172 = vmatpush3.bf16.msra.mxu1 %v1169_v13 }
   0xc   :  { %896 = vmatmul.mubr.msk.f32.gmra.mrb[4].mxu0 %vm33_vm0, %v29_v22  ;;  %1174 = vmatprep.subr.bf16.mxu1 %v1173_v21 }
   0xd   :  { %12 = vsyncpa [#allocation3], 0  ;;  %128 = vmatprep.mubr.f32.mxu0 %v1387_v3  ;;  %v30_v29 = vld [vmem:[%s1691_s0 + $0x18] sm:$0xff]  ;;  %1204 = vmatpush3.bf16.msra.mxu0 %v1201_v17  ;;  %v159_v30 = vld [vmem:[%s1695_s4 + $0x40] sm:$0xff]  ;;  %v1209_v32 = vpack.c.bf16 %v142_v27, %v141_v26  ;;  %s1390_s27 = smov 96   ;;  %vm297_vm1 = vcmask 261120  }
   0xe   :  { %v160_v31 = vld [vmem:[%s1695_s4 + $0x48] sm:$0xff]  ;;  %1206 = vmatprep.subr.bf16.mxu0 %v1205_v25  ;;  %v143_v33 = vld [vmem:[%s1694_s3 + $0x40] sm:$0xff]  ;;  %v161_v36 = vld [vmem:[%s1695_s4 + $0x50] sm:$0xff]  ;;  %vm299_vm2 = vcmask 523264   ;;  %vm301_vm3 = vcmask 785408   ;;  %vm1392_vm8 = vmmov 0  }
   0xf   :  { %1176 = vmatpush3.bf16.msra.mxu1 %v1173_v21  ;;  %v144_v34 = vld [vmem:[%s1694_s3 + $0x48] sm:$0xff]  ;;  %v1181_v35 = vpack.c.bf16 %v160_v31, %v159_v30  ;;  %v162_v37 = vld [vmem:[%s1695_s4 + $0x58] sm:$0xff]  ;;  %v145_v39 = vld [vmem:[%s1694_s3 + $0x50] sm:$0xff] }
  0x10   :  { %897 = vmatmul.mubr.msk.f32.gmra.mrb[6].mxu0 %vm33_vm0, %v30_v29  ;;  %1178 = vmatprep.subr.bf16.mxu1 %v1177_v28  ;;  %v1213_v38 = vpack.c.bf16 %v144_v34, %v143_v33  ;;  %v146_v40 = vld [vmem:[%s1694_s3 + $0x58] sm:$0xff]  ;;  %v1185_v41 = vpack.c.bf16 %v162_v37, %v161_v36  ;;  %v163_v42 = vld [vmem:[%s1695_s4 + $0x60] sm:$0xff]  ;;  %v164_v43 = vld [vmem:[%s1695_s4 + $0x68] sm:$0xff] }
  0x11   :  { %1208 = vmatpush3.bf16.msra.mxu0 %v1205_v25  ;;  %v1217_v44 = vpack.c.bf16 %v146_v40, %v145_v39  ;;  %v147_v45 = vld [vmem:[%s1694_s3 + $0x60] sm:$0xff]  ;;  %v148_v46 = vld [vmem:[%s1694_s3 + $0x68] sm:$0xff]  ;;  %v1189_v47 = vpack.c.bf16 %v164_v43, %v163_v42  ;;  %v165_v49 = vld [vmem:[%s1695_s4 + $0x70] sm:$0xff] }
  0x12   :  { %1210 = vmatprep.subr.bf16.mxu0 %v1209_v32  ;;  %v1221_v48 = vpack.c.bf16 %v148_v46, %v147_v45  ;;  %v166_v50 = vld [vmem:[%s1695_s4 + $0x78] sm:$0xff]  ;;  %v149_v51 = vld [vmem:[%s1694_s3 + $0x70] sm:$0xff]  ;;  %s1389_s4 = smov 64   ;;  %v432_v16 = vld [vmem:[%s1696_s5] sm:$0xff] }
  0x13   :  { %1180 = vmatpush3.bf16.msra.mxu1 %v1177_v28  ;;  %v1193_v52 = vpack.c.bf16 %v166_v50, %v165_v49  ;;  %v150_v53 = vld [vmem:[%s1694_s3 + $0x78] sm:$0xff]  ;;  %s1388_s3 = smov 32   ;;  %v433_v17 = vld [vmem:[%s1696_s5 + $0x8] sm:$0xff]  ;;  %v434_v18 = vld [vmem:[%s1696_s5 + $0x10] sm:$0xff]  ;;  %v303_v28 = vlaneseq }
  0x14   :  { %1182 = vmatprep.subr.bf16.mxu1 %v1181_v35  ;;  %v1225_v54 = vpack.c.bf16 %v150_v53, %v149_v51  ;;  %v1229_v19 = vpack.c.bf16 %v433_v17, %v432_v16  ;;  %v435_v20 = vld [vmem:[%s1696_s5 + $0x18] sm:$0xff]  ;;  %v436_v22 = vld [vmem:[%s1696_s5 + $0x20] sm:$0xff]  ;;  %v437_v23 = vld [vmem:[%s1696_s5 + $0x28] sm:$0xff] }
  0x15   :  { %1212 = vmatpush3.bf16.msra.mxu0 %v1209_v32  ;;  %v1233_v21 = vpack.c.bf16 %v435_v20, %v434_v18  ;;  %v1237_v24 = vpack.c.bf16 %v437_v23, %v436_v22  ;;  %v438_v25 = vld [vmem:[%s1696_s5 + $0x30] sm:$0xff]  ;;  %v439_v26 = vld [vmem:[%s1696_s5 + $0x38] sm:$0xff]  ;;  %v304_v30 = vshrl.u32 %v303_v28, 7  ;;  %v404_v42 = vld [vmem:[%s1692_s1] sm:$0xff] }
  0x16   :  { %1214 = vmatprep.subr.bf16.mxu0 %v1213_v38  ;;  %v1241_v27 = vpack.c.bf16 %v439_v26, %v438_v25 }
  0x17   :  { %1184 = vmatpush3.bf16.msra.mxu1 %v1181_v35  ;;  %v1598_v32 = vsub.s32 0, %v304_v30 }
  0x18   :  { %1186 = vmatprep.subr.bf16.mxu1 %v1185_v41 }
  0x19   :  { %1216 = vmatpush3.bf16.msra.mxu0 %v1213_v38 }
  0x1a   :  { %1218 = vmatprep.subr.bf16.mxu0 %v1217_v44 }
  0x1b   :  { %1188 = vmatpush3.bf16.msra.mxu1 %v1185_v41  ;;  %v405_v41 = vld [vmem:[%s1692_s1 + $0x8] sm:$0xff] }
  0x1c   :  { %1190 = vmatprep.subr.bf16.mxu1 %v1189_v47 }
  0x1d   :  { %1220 = vmatpush3.bf16.msra.mxu0 %v1217_v44 }
  0x1e   :  { %1222 = vmatprep.subr.bf16.mxu0 %v1221_v48 }
  0x1f   :  { %1192 = vmatpush3.bf16.msra.mxu1 %v1189_v47 }
  0x20   :  { %1194 = vmatprep.subr.bf16.mxu1 %v1193_v52 }
  0x21   :  { %1224 = vmatpush3.bf16.msra.mxu0 %v1221_v48 }
  0x22   :  { %1226 = vmatprep.subr.bf16.mxu0 %v1225_v54 }
  0x23   :  { %1196 = vmatpush3.bf16.msra.mxu1 %v1193_v52  ;;  %v406_v52 = vld [vmem:[%s1692_s1 + $0x10] sm:$0xff] }
  0x24   :  { %1230 = vmatprep.subr.bf16.mxu1 %v1229_v19 }
  0x25   :  { %1228 = vmatpush3.bf16.msra.mxu0 %v1225_v54 }
  0xd7   :  { %v112_v55 = vpop.f32.mrb[0].mxu0 }
  0xd8   :  { %v1559_v56 = vpop.f32.mrb[1].mxu0  ;;  %1023 = vmatprep.mubr.f32.mxu1 %v112_v55  ;;  %1061 = vmatprep.mubr.f32.mxu0 %v112_v55 }
  0xdb   :  { %v118_v57 = vpop.f32.mrb[2].mxu0 }
  0xdc   :  { %v1561_v58 = vpop.f32.mrb[3].mxu0  ;;  %1024 = vmatmul.mubr.f32.vlgmr.msra.gmra.mrb[0].mxu1 %v118_v57  ;;  %1062 = vmatmul.mubr.f32.vlgmr.msra.gmra.mrb[8].mxu0 %v118_v57  ;;  %v1261_v59 = vpack.c.bf16 %v118_v57, %v112_v55  ;;  %v1563_v60 = vpack.i.bf16 %v118_v57, %v112_v55  ;;  %v407_v57 = vld [vmem:[%s1692_s1 + $0x18] sm:$0xff] }
  0xdd   :  { %1232 = vmatpush3.bf16.msra.mxu1 %v1229_v19 }
  0xde   :  { %1262 = vmatprep.subr.bf16.mxu0 %v1261_v59  ;;  %1234 = vmatprep.subr.bf16.mxu1 %v1233_v21 }
  0xdf   :  { %v124_v61 = vpop.f32.mrb[4].mxu0  ;;  %1264 = vmatpush3.bf16.msra.mxu0 %v1261_v59 }
  0xe0   :  { %v1565_v62 = vpop.f32.mrb[5].mxu0  ;;  %1026 = vmatprep.mubr.f32.mxu1 %v124_v61  ;;  %1064 = vmatprep.mubr.f32.mxu0 %v124_v61 }
  0xe1   :  { %1236 = vmatpush3.bf16.msra.mxu1 %v1233_v21 }
  0xe2   :  { %1238 = vmatprep.subr.bf16.mxu1 %v1237_v24 }
  0xe3   :  { %v130_v63 = vpop.f32.mrb[6].mxu0 }
  0xe4   :  { %v1567_v0 = vpop.f32.mrb[7].mxu0  ;;  %1027 = vmatmul.mubr.f32.gmra.mrb[2].mxu1 %v130_v63  ;;  %1065 = vmatmul.mubr.f32.gmra.mrb[10].mxu0 %v130_v63  ;;  %v1265_v1 = vpack.c.bf16 %v130_v63, %v124_v61  ;;  %v1569_v2 = vpack.i.bf16 %v130_v63, %v124_v61  ;;  %v440_v61 = vld [vmem:[%s1696_s5 + $0x40] sm:$0xff]  ;;  %v441_v63 = vld [vmem:[%s1696_s5 + $0x48] sm:$0xff] }
  0xe5   :  { %1240 = vmatpush3.bf16.msra.mxu1 %v1237_v24 }
  0xe6   :  { %1266 = vmatprep.subr.bf16.mxu0 %v1265_v1  ;;  %1242 = vmatprep.subr.bf16.mxu1 %v1241_v27 }
  0xe7   :  { %1268 = vmatpush3.bf16.msra.mxu0 %v1265_v1  ;;  %v1245_v1 = vpack.c.bf16 %v441_v63, %v440_v61 }
  0xe9   :  { %1244 = vmatpush3.bf16.msra.mxu1 %v1241_v27 }
  0xea   :  { %1246 = vmatprep.subr.bf16.mxu1 %v1245_v1 }
  0xed   :  { %1248 = vmatpush3.bf16.msra.mxu1 %v1245_v1 }
 0x1af   :  { %v1025_v4 = vpop.f32.mrb[0].mxu1  ;;  %v1063_v5 = vpop.f32.mrb[8].mxu0 }
 0x1b0   :  { %v233_v6 = vpop.f32.mrb[1].mxu1  ;;  %v373_v7 = vpop.f32.mrb[9].mxu0 }
 0x1b1   :  { %252 = vxpose.xlu0.b32.start [1/4] (short) (narrow) %v233_v6, 8 }
 0x1b5   :  { %253 = vxpose.xlu0.b32.cont [2/4] (short) (narrow) %v1025_v4, 8  ;;  %v442_v4 = vld [vmem:[%s1696_s5 + $0x50] sm:$0xff] }
 0x1b7   :  { %v1028_v8 = vpop.f32.mrb[2].mxu1  ;;  %v1066_v9 = vpop.f32.mrb[10].mxu0 }
 0x1b8   :  { %v243_v10 = vpop.f32.mrb[3].mxu1  ;;  %v383_v11 = vpop.f32.mrb[11].mxu0 }
 0x1b9   :  { %254 = vxpose.xlu0.b32.cont [3/4] (short) (narrow) %v243_v10, 8  ;;  %v446_v10 = vld [vmem:[%s1696_s5 + $0x70] sm:$0xff] }
 0x1bd   :  { %255 = vxpose.xlu0.b32.end [4/4] (short) (narrow) %v1028_v8, 8  ;;  %v445_v8 = vld [vmem:[%s1696_s5 + $0x68] sm:$0xff] }
 0x231   :  { %v268_v12 = vpop.trf.xlu0 }
 0x232   :  { %v285_v13 = vrot.slane %v268_v12, 1  ;;  %v289_v14 = vrot.slane %v268_v12, 2  ;;  %v293_v15 = vrot.slane %v268_v12, 3 }
 0x234   :  { %286 = vrot.lane.b32.xlu1 %v285_v13, %s1388_s3 }
 0x238   :  { %290 = vrot.lane.b32.xlu1 %v289_v14, %s1389_s4 }
 0x23c   :  { %294 = vrot.lane.b32.xlu1 %v293_v15, %s1390_s27 }
 0x2a6   :  { %v287_v29 = vpop.permute.xlu1 %286 }
 0x2a7   :  { %v298_v33 = vsel %vm297_vm1, %v268_v12, %v287_v29 }
 0x2aa   :  { %v291_v31 = vpop.permute.xlu1 %290 }
 0x2ab   :  { %v300_v34 = vsel %vm299_vm2, %v298_v33, %v291_v31 }
 0x2ae   :  { %v295_v35 = vpop.permute.xlu1 %294 }
 0x2af   :  { %v302_v36 = vsel %vm301_vm3, %v300_v34, %v295_v35 }
 0x2b0   :  { %v306_v37 = vrot.slane %v302_v36, %v1598_v32 }
 0x2b2   :  { %v379_v38 = vadd.f32 %v1063_v5, %v306_v37  ;;  %v374_v39 = vadd.f32 %v373_v7, %v306_v37  ;;  %v384_v40 = vadd.f32 %v383_v11, %v306_v37  ;;  %v389_v43 = vadd.f32 %v1066_v9, %v306_v37  ;;  %v443_v5 = vld [vmem:[%s1696_s5 + $0x58] sm:$0xff]  ;;  %v444_v7 = vld [vmem:[%s1696_s5 + $0x60] sm:$0xff] }
 0x2b3   :  { %v1249_v6 = vpack.c.bf16 %v443_v5, %v442_v4  ;;  %v1253_v9 = vpack.c.bf16 %v445_v8, %v444_v7  ;;  %v447_v11 = vld [vmem:[%s1696_s5 + $0x78] sm:$0xff] }
 0x2b4   :  { %vm393_vm4 = vcmp.gt.f32.partialorder %v379_v38, 0.0  ;;  %v397_v44 = vmul.f32 0.01, %v379_v38  ;;  %vm392_vm5 = vcmp.gt.f32.partialorder %v374_v39, 0.0  ;;  %v396_v45 = vmul.f32 0.01, %v374_v39 }
 0x2b5   :  { %vm394_vm6 = vcmp.gt.f32.partialorder %v384_v40, 0.0  ;;  %v398_v46 = vmul.f32 0.01, %v384_v40  ;;  %v399_v53 = vmul.f32 0.01, %v389_v43  ;;  %vm395_vm7 = vcmp.gt.f32.partialorder %v389_v43, 0.0  ;;  %1250 = vmatprep.subr.bf16.mxu1 %v1249_v6 }
 0x2b6   :  { %v401_v47 = vsel %vm393_vm4, %v379_v38, %v397_v44  ;;  %v400_v48 = vsel %vm392_vm5, %v374_v39, %v396_v45  ;;  %1252 = vmatpush3.bf16.msra.mxu1 %v1249_v6  ;;  %v1257_v12 = vpack.c.bf16 %v447_v11, %v446_v10  ;;  %v1391_v11 = vmov 0.0|0.0  }
 0x2b7   :  { %v409_v49 = vadd.f32 %v405_v41, %v401_v47  ;;  %v408_v50 = vadd.f32 %v404_v42, %v400_v48  ;;  %v402_v51 = vsel %vm394_vm6, %v384_v40, %v398_v46  ;;  %v403_v55 = vsel %vm395_vm7, %v389_v43, %v399_v53  ;;  %1254 = vmatprep.subr.bf16.mxu1 %v1253_v9 }
 0x2b8   :  { %v410_v54 = vadd.f32 %v406_v52, %v402_v51  ;;  %v411_v59 = vadd.f32 %v407_v57, %v403_v55 }
 0x2b9   :  { %414 = vmax.xlane.f32.xlu0 %v409_v49  ;;  %412 = vmax.xlane.f32.xlu1 %v408_v50 }
 0x2ba   :  { %1256 = vmatpush3.bf16.msra.mxu1 %v1253_v9 }
 0x2bb   :  { %1258 = vmatprep.subr.bf16.mxu1 %v1257_v12 }
 0x2bd   :  { %416 = vmax.xlane.f32.xlu1 %v410_v54 }
 0x2be   :  { %1260 = vmatpush3.bf16.msra.mxu1 %v1257_v12 }
 0x2bf   :  { %1293 = vmatprep.subr.bf16.mxu1 %v1391_v11 }
 0x2c1   :  { %418 = vmax.xlane.f32.xlu1 %v411_v59 }
 0x2cf   :  { %1321 = vrot.lane.b32.xlu0 %v1569_v2, %s1390_s27 }
 0x2d2   :  { %1316 = vrot.lane.b32.xlu1 %v1563_v60, %s1390_s27 }
 0x2d3   :  { %1341 = vrot.lane.b32.xlu0 %v1569_v2, %s1388_s3 }
 0x2d6   :  { %1326 = vrot.lane.b32.xlu1 %v1563_v60, %s1389_s4 }
 0x2da   :  { %1331 = vrot.lane.b32.xlu1 %v1569_v2, %s1389_s4  ;;  %s1394_s4 = smov [#allocation2]  }
 0x2db   :  { %s883_s27 = sshll.u32 %s1394_s4, 4  ;;  %s884_s27 = int_to_ptr.vmem [resolvable:$true] %s883_s27 }
 0x2dc   :  { %s1363_s20 = scalar_lea.vmem %s884_s27, 512  ;;  %p1368_p1 = scmp.lt.s32.totalorder %s884_s27, %s884_s27 }
 0x2dd   :  { %p1364_p0 = scmp.ne.s32.totalorder %s884_s27, %s1363_s20  ;;  %p1369_p2 = scmp.lt.s32.totalorder %s1363_s20, %s1363_s20 }
 0x2de   :  { %1336 = vrot.lane.b32.xlu1 %v1563_v60, %s1388_s3 }
 0x2df   :  { %p1370_p3 = por %p1369_p2, %p1368_p1 }
 0x2e1   :  { %p1371_p4 = pnand %p1370_p3, %p1364_p0 }
 0x346   :  { %v415_v13 = vpop.xlane.xlu0 %414  ;;  %v413_v14 = vpop.xlane.xlu1 %412 }
 0x347   :  { %v421_v15 = vsub.f32 %v409_v49, %v415_v13  ;;  %v420_v16 = vsub.f32 %v408_v50, %v413_v14 }
 0x349   :  { %v426_v17 = vmul.f32 1.442695, %v421_v15  ;;  %v424_v18 = vmul.f32 1.442695, %v420_v16 }
 0x34a   :  { %v417_v19 = vpop.xlane.xlu1 %416  ;;  %v1322_v23 = vpop.permute.xlu0 %1321 }
 0x34b   :  { %1345 = vpow2.f32 %v426_v17  ;;  %v422_v20 = vsub.f32 %v410_v54, %v417_v19  ;;  %v1324_v2 = vunpack.i.h.bf16 %v1322_v23  ;;  %v1323_v27 = vunpack.i.l.bf16 %v1322_v23 }
 0x34c   :  { %1347 = vpow2.f32 %v424_v18 }
 0x34d   :  { %v428_v21 = vmul.f32 1.442695, %v422_v20  ;;  %v1273_v34 = vpack.c.bf16 %v1324_v2, %v1323_v27 }
 0x34e   :  { %v419_v22 = vpop.xlane.xlu1 %418  ;;  %v1342_v47 = vpop.permute.xlu0 %1341 }
 0x34f   :  { %1349 = vpow2.f32 %v428_v21  ;;  %v423_v24 = vsub.f32 %v411_v59, %v419_v22  ;;  %v1344_v48 = vunpack.i.h.bf16 %v1342_v47  ;;  %v1343_v49 = vunpack.i.l.bf16 %v1342_v47 }
 0x351   :  { %v430_v25 = vmul.f32 1.442695, %v423_v24  ;;  %v1289_v51 = vpack.c.bf16 %v1344_v48, %v1343_v49  ;;  %v900_v49 = vld [vmem:[%s1697_s6 + $0x1] ss:$0 sm:$0xff] }
 0x352   :  { %v1317_v26 = vpop.permute.xlu1 %1316 }
 0x353   :  { %1351 = vpow2.f32 %v430_v25  ;;  %v1319_v60 = vunpack.i.h.bf16 %v1317_v26  ;;  %v1318_v28 = vunpack.i.l.bf16 %v1317_v26 }
 0x355   :  { %v1346_v29 = vpop.eup %1345  ;;  %v1269_v30 = vpack.c.bf16 %v1319_v60, %v1318_v28 }
 0x356   :  { %v1348_v31 = vpop.eup %1347  ;;  %v1327_v33 = vpop.permute.xlu1 %1326 }
 0x357   :  { %1099 = vmatprep.mubr.f32.mxu1 %v1348_v31  ;;  %v1329_v35 = vunpack.i.h.bf16 %v1327_v33  ;;  %v1328_v36 = vunpack.i.l.bf16 %v1327_v33  ;;  %1270 = vmatprep.subr.bf16.mxu0 %v1269_v30 }
 0x358   :  { %1100 = vmatmul.mubr.f32.vlgmr.msra.gmra.mrb[4].mxu1 %v1346_v29  ;;  %1272 = vmatpush3.bf16.msra.mxu0 %v1269_v30 }
 0x359   :  { %v1350_v37 = vpop.eup %1349  ;;  %1274 = vmatprep.subr.bf16.mxu0 %v1273_v34  ;;  %v1277_v39 = vpack.c.bf16 %v1329_v35, %v1328_v36 }
 0x35a   :  { %1102 = vmatprep.mubr.f32.mxu1 %v1350_v37  ;;  %v1332_v38 = vpop.permute.xlu1 %1331 }
 0x35b   :  { %v1334_v40 = vunpack.i.h.bf16 %v1332_v38  ;;  %v1333_v41 = vunpack.i.l.bf16 %v1332_v38 }
 0x35c   :  { %1276 = vmatpush3.bf16.msra.mxu0 %v1273_v34 }
 0x35d   :  { %v1352_v42 = vpop.eup %1351  ;;  %1278 = vmatprep.subr.bf16.mxu0 %v1277_v39  ;;  %v1281_v44 = vpack.c.bf16 %v1334_v40, %v1333_v41  ;;  %v847_v41 = vld [vmem:[%s1697_s6] sm:$0x1] }
 0x35e   :  { %1103 = vmatmul.mubr.f32.gmra.mrb[6].mxu1 %v1352_v42  ;;  %v1337_v43 = vpop.permute.xlu1 %1336 }
 0x35f   :  { %v1339_v45 = vunpack.i.h.bf16 %v1337_v43  ;;  %v1338_v46 = vunpack.i.l.bf16 %v1337_v43  ;;  %1151 = vmatprep.mubr.msk.f32.mxu1 %vm1392_vm8, %v1387_v3 }
 0x360   :  { %1280 = vmatpush3.bf16.msra.mxu0 %v1277_v39 }
 0x361   :  { %1282 = vmatprep.subr.bf16.mxu0 %v1281_v44  ;;  %v1285_v50 = vpack.c.bf16 %v1339_v45, %v1338_v46 }
 0x364   :  { %1284 = vmatpush3.bf16.msra.mxu0 %v1281_v44 }
 0x365   :  { %1286 = vmatprep.subr.bf16.mxu0 %v1285_v50 }
 0x368   :  { %1288 = vmatpush3.bf16.msra.mxu0 %v1285_v50 }
 0x369   :  { %1290 = vmatprep.subr.bf16.mxu0 %v1289_v51 }
 0x36c   :  { %1292 = vmatpush3.bf16.msra.mxu0 %v1289_v51 }
 0x36d   :  { %1299 = vmatprep.subr.bf16.mxu0 %v1391_v11 }
 0x42b   :  { %v1101_v52 = vpop.f32.mrb[4].mxu1 }
 0x42c   :  { %v534_v53 = vmax.f32 %v1101_v52, 1e-30  ;;  %v514_v54 = vpop.f32.mrb[5].mxu1 }
 0x42d   :  { %v533_v55 = vmax.f32 %v514_v54, 1e-30 }
 0x42e   :  { %1353 = vrcp.f32 %v534_v53 }
 0x42f   :  { %1355 = vrcp.f32 %v533_v55 }
 0x431   :  { %v1104_v57 = vpop.f32.mrb[6].mxu1 }
 0x432   :  { %v536_v59 = vmax.f32 %v1104_v57, 1e-30  ;;  %v524_v61 = vpop.f32.mrb[7].mxu1 }
 0x433   :  { %v535_v63 = vmax.f32 %v524_v61, 1e-30 }
 0x434   :  { %1357 = vrcp.f32 %v536_v59 }
 0x435   :  { %1359 = vrcp.f32 %v535_v63 }
 0x438   :  { %v1354_v1 = vpop.eup %1353 }
 0x439   :  { %v1356_v4 = vpop.eup %1355  ;;  %v542_v6 = vmul.f32 %v1354_v1, %v1346_v29 }
 0x43a   :  { %v541_v5 = vmul.f32 %v1356_v4, %v1348_v31 }
 0x43c   :  { %1137 = vmatprep.mubr.f32.mxu0 %v541_v5 }
 0x43d   :  { %1138 = vmatmul.mubr.f32.vlgmr.msra.gmra.mrb[12].mxu0 %v542_v6 }
 0x43e   :  { %v1358_v7 = vpop.eup %1357 }
 0x43f   :  { %v1360_v8 = vpop.eup %1359  ;;  %v544_v10 = vmul.f32 %v1358_v7, %v1352_v42 }
 0x440   :  { %v543_v9 = vmul.f32 %v1360_v8, %v1350_v37 }
 0x442   :  { %1140 = vmatprep.mubr.f32.mxu0 %v543_v9 }
 0x443   :  { %1141 = vmatmul.mubr.f32.gmra.mrb[14].mxu0 %v544_v10 }
 0x444   :  { %1162 = vmatprep.mubr.msk.f32.mxu0 %vm1392_vm8, %v1387_v3 }
 0x510   :  { %v1139_v12 = vpop.f32.mrb[12].mxu0 }
 0x511   :  { %v671_v13 = vmul.f32 0.25, %v1139_v12  ;;  %v651_v14 = vpop.f32.mrb[13].mxu0 }
 0x512   :  { %v670_v15 = vmul.f32 0.25, %v651_v14 }
 0x513   :  { %680 = vrot.lane.b32.xlu0 %v671_v13, %s1388_s3 }
 0x514   :  { %678 = vrot.lane.b32.xlu1 %v670_v15, %s1388_s3 }
 0x516   :  { %v1142_v16 = vpop.f32.mrb[14].mxu0 }
 0x517   :  { %v673_v17 = vmul.f32 0.25, %v1142_v16  ;;  %v661_v18 = vpop.f32.mrb[15].mxu0 }
 0x518   :  { %v672_v19 = vmul.f32 0.25, %v661_v18 }
 0x519   :  { %684 = vrot.lane.b32.xlu0 %v673_v17, %s1388_s3 }
 0x51a   :  { %682 = vrot.lane.b32.xlu1 %v672_v19, %s1388_s3 }
 0x585   :  { %v681_v20 = vpop.permute.xlu0 %680 }
 0x586   :  { %v691_v21 = vsel %vm297_vm1, %v1561_v58, %v681_v20  ;;  %v679_v22 = vpop.permute.xlu1 %678 }
 0x587   :  { %v768_v23 = vmul.f32 %v691_v21, %v691_v21  ;;  %v690_v3 = vsel %vm297_vm1, %v1559_v56, %v679_v22  ;;  %v1393_v56 = vmov 1.0  }
 0x588   :  { %v1294_v24 = vpack.c.bf16 %v691_v21, %v690_v3  ;;  %v767_v25 = vmul.f32 %v690_v3, %v690_v3 }
 0x58a   :  { %v1300_v2 = vpack.c.bf16 %v768_v23, %v767_v25  ;;  %1295 = vmatpush3.bf16.msra.mxu1 %v1294_v24 }
 0x58b   :  { %v685_v26 = vpop.permute.xlu0 %684  ;;  %1296 = vmatprep.subr.bf16.mxu1 %v1391_v11 }
 0x58c   :  { %1301 = vmatpush3.bf16.msra.mxu0 %v1300_v2  ;;  %v693_v27 = vsel %vm297_vm1, %v1567_v0, %v685_v26  ;;  %v683_v60 = vpop.permute.xlu1 %682 }
 0x58d   :  { %v770_v28 = vmul.f32 %v693_v27, %v693_v27  ;;  %v692_v58 = vsel %vm297_vm1, %v1565_v62, %v683_v60  ;;  %1302 = vmatprep.subr.bf16.mxu0 %v1391_v11 }
 0x58e   :  { %v1297_v29 = vpack.c.bf16 %v693_v27, %v692_v58  ;;  %v769_v30 = vmul.f32 %v692_v58, %v692_v58 }
 0x590   :  { %v1303_v31 = vpack.c.bf16 %v770_v28, %v769_v30  ;;  %1298 = vmatpush3.bf16.msra.mxu1 %v1297_v29 }
 0x592   :  { %1304 = vmatpush3.bf16.msra.mxu0 %v1303_v31 }
 0x593   :  { %1152 = vmatmul.mubr.msk.f32.vlgmr.msra.gmra.mrb[8].mxu1 %vm297_vm1, %v1393_v56 }
 0x595   :  { %1163 = vmatmul.mubr.msk.f32.vlgmr.msra.gmra.mrb[16].mxu0 %vm297_vm1, %v1393_v56 }
 0x666   :  { %v763_v33 = vpop.f32.mrb[8].mxu1 }
 0x667   :  { %v841_v34 = vmul.f32 0.03125, %v763_v33  ;;  %v1153_v35 = vpop.f32.mrb[9].mxu1 }
 0x668   :  { %v837_v0 = vpop.f32.mrb[16].mxu0 }
 0x669   :  { %v843_v36 = vmul.f32 %v841_v34, %v841_v34  ;;  %v842_v37 = vmul.f32 0.03125, %v837_v0  ;;  %v1164_v38 = vpop.f32.mrb[17].mxu0  ;;  %v852_v40 = vrot.slane %v841_v34, %v1598_v32 }
 0x66b   :  { %v844_v39 = vsub.f32 %v842_v37, %v843_v36  ;;  %v853_v44 = vsub.f32 %v690_v3, %v852_v40  ;;  %v854_v45 = vsub.f32 %v691_v21, %v852_v40  ;;  %v855_v46 = vsub.f32 %v692_v58, %v852_v40 }
 0x66c   :  { %v856_v47 = vsub.f32 %v693_v27, %v852_v40 }
 0x66d   :  { %v845_v62 = vadd.f32 1e-05, %v844_v39 }
 0x66f   :  { %1361 = vrsqrt.f32 %v845_v62 }
 0x679   :  { %v1362_v42 = vpop.eup %1361 }
 0x67a   :  { %v857_v43 = vmul.f32 %v1362_v42, %v847_v41 }
 0x67c   :  { %v861_v48 = vrot.slane %v857_v43, %v1598_v32 }
 0x67e   :  { %v862_v50 = vmul.f32 %v861_v48, %v853_v44  ;;  %v863_v51 = vmul.f32 %v861_v48, %v854_v45  ;;  %v864_v52 = vmul.f32 %v861_v48, %v855_v46  ;;  %v865_v53 = vmul.f32 %v861_v48, %v856_v47 }
 0x680   :  { %v870_v54 = vadd.f32 %v900_v49, %v862_v50  ;;  %v871_v55 = vadd.f32 %v900_v49, %v863_v51  ;;  %v872_v57 = vadd.f32 %v900_v49, %v864_v52  ;;  %v873_v59 = vadd.f32 %v900_v49, %v865_v53 }
 0x682   :  { %874 = vst.msk [vmem:[#allocation2] sm:$0xff] %vm299_vm2, %v870_v54  ;;  %875 = vst.msk [vmem:[#allocation2 + $0x8] sm:$0xff] %vm299_vm2, %v871_v55 }
 0x683   :  { %876 = vst.msk [vmem:[#allocation2 + $0x10] sm:$0xff] %vm299_vm2, %v872_v57  ;;  %877 = vst.msk [vmem:[#allocation2 + $0x18] sm:$0xff] %vm299_vm2, %v873_v59 }
 0x684   :  { %1374 = shalt.err (!%p1371_p4)
}
 0x685   :  { %s1375_s22 = scalar_lea.hbm %s1698_s7, 512 }
 0x686   :  { %p1376_p5 = scmp.ne.s32.totalorder %s1698_s7, %s1375_s22  ;;  %p1379_p6 = scmp.lt.u32.totalorder %s1375_s22, %s1698_s7 }
 0x688   :  { %p1381_p7 = pnand %p1379_p6, %p1376_p5 }
 0x68a   :  { %1384 = shalt.err (!%p1381_p7)
}
 0x68b   :  { %s1395_s0 = smov 128   ;;  %s1396_s28 = smov 8  }
 0x68c   :  { %889 = dma.vmem_to_hbm [thread:$0]  %s884_s27, 512, %s1698_s7, [#allocation3], %s1395_s0, %s1395_s0, %s1396_s28  }
 0x68d   :  { %1385 = dma.done.wait [#allocation3], 512  }
 0x68e   :  { %1386 = vsyncadd [#allocation3], 4294966784 }
 0x68f   :  { %893 = vsyncpa [#allocation3], 1 }

</bundles_post_ra>
